<compile_context>
chip_gen: v5e
topology: v5e:2x2
jax: 0.10.0
libtpu: 0.0.40
codegen_flags: <defaults>
</compile_context>

<pallas_src>
import jax
import jax.numpy as jnp
from jax import lax
from jax.experimental import pallas as pl
from jax.experimental.pallas import tpu as pltpu


def _round_up(x: int, m: int) -> int:
    return ((x + m - 1) // m) * m


def _linear_kernel(x_ref, w_ref, b_ref, o_ref):
    # x_ref: (TM, K) bf16   w_ref: (N_pad, K) bf16   b_ref: (1, N_pad) f32
    # o_ref: (TM, N_pad) f32-like output dtype
    acc = lax.dot_general(
        x_ref[...], w_ref[...],
        dimension_numbers=(((1,), (1,)), ((), ())),   # contract K against K
        preferred_element_type=jnp.float32,           # f32 accumulation on MXU
    )
    o_ref[...] = (acc + b_ref[...]).astype(o_ref.dtype)


def linear_decoder_forward(enc_outs, weight, bias):
    """enc_outs: (B, S, E); weight: (O, E); bias: (O,) -> (B, S, O)."""
    B, S, E = enc_outs.shape
    O = weight.shape[0]
    out_dtype = enc_outs.dtype

    M = B * S
    K = E
    N_pad = _round_up(O, 128)                 # lane-dense output (unmasked vst)

    # ---- glue: flatten, pad, cast (bf16 operands, f32 accumulate) -----------
    x = enc_outs.reshape(M, K)

    # M tile: multiple of 8 sublanes; ~512 rows hits the HBM roofline sweet
    # spot while staying far under the scoped VMEM limit (incl. v7x's 64 MiB).
    M_pad8 = _round_up(M, 8)
    TM = min(512, M_pad8)
    M_pad = _round_up(M, TM)

    x_p = jnp.pad(x, ((0, M_pad - M), (0, 0))).astype(jnp.bfloat16)
    w_p = jnp.pad(weight, ((0, N_pad - O), (0, 0))).astype(jnp.bfloat16)  # (N_pad, K)
    b_p = jnp.pad(bias, (0, N_pad - O)).reshape(1, N_pad).astype(jnp.float32)

    grid_m = M_pad // TM

    # ---- VMEM budget + cost hint --------------------------------------------
    x_tile_b = TM * K * 2
    o_tile_b = TM * N_pad * 4
    w_b = N_pad * K * 2
    b_b = N_pad * 4
    vmem_limit = 2 * (x_tile_b + o_tile_b) + 2 * (w_b + b_b) + (4 << 20)
    vmem_limit = int(min(max(vmem_limit, 8 << 20), 64 << 20))

    cost = pl.CostEstimate(
        flops=2 * M_pad * K * N_pad,
        transcendentals=0,
        bytes_accessed=M_pad * K * 2 + w_b + b_b + M_pad * N_pad * 4,
    )

    out = pl.pallas_call(
        _linear_kernel,
        out_shape=jax.ShapeDtypeStruct((M_pad, N_pad), out_dtype),
        grid_spec=pltpu.PrefetchScalarGridSpec(
            num_scalar_prefetch=0,
            grid=(grid_m,),
            in_specs=[
                pl.BlockSpec((TM, K), lambda i: (i, 0)),       # x: tiled over M
                pl.BlockSpec((N_pad, K), lambda i: (0, 0)),    # W: VMEM-resident
                pl.BlockSpec((1, N_pad), lambda i: (0, 0)),    # bias: resident
            ],
            out_specs=pl.BlockSpec((TM, N_pad), lambda i: (i, 0)),
        ),
        compiler_params=pltpu.CompilerParams(
            dimension_semantics=("parallel",),                 # 2 TCs on v7x
            vmem_limit_bytes=vmem_limit,
        ),
        cost_estimate=cost,
    )(x_p, w_p, b_p)

    return out[:M, :O].reshape(B, S, O)


if __name__ == "__main__":
    # Module config (synthetic, small): enc_dim=32, out_dim=16 (vocab-ish)
    enc_dim, out_dim = 32, 16
    batch, seq = 2, 8

    key = jax.random.PRNGKey(0)
    k_x, k_w, k_b = jax.random.split(key, 3)

    # Deterministic param init (same shapes as nn.Linear(enc_dim, out_dim)):
    #   weight: (out_dim, enc_dim), bias: (out_dim,)
    bound = 1.0 / (enc_dim ** 0.5)
    weight = jax.random.uniform(k_w, (out_dim, enc_dim), jnp.float32, -bound, bound)
    bias = jax.random.uniform(k_b, (out_dim,), jnp.float32, -bound, bound)

    enc_outs = jax.random.normal(k_x, (batch, seq, enc_dim), jnp.float32)

    out = linear_decoder_forward(enc_outs, weight, bias)
    out = jax.block_until_ready(out)

    # Correctness check against plain-JAX reference of the PyTorch forward.
    # bf16 matmul operands with f32 accumulation -> loosened tolerance.
    ref = enc_outs @ weight.T + bias
    assert out.shape == (batch, seq, out_dim)
    assert jnp.allclose(out, ref, atol=1e-2, rtol=1e-2), (
        float(jnp.max(jnp.abs(out - ref))))

    print("KERNEL_OK")
</pallas_src>

<mosaic_0001>
module attributes {stable_mosaic.version = 11 : i64} {
  func.func @_linear_kernel(%arg0: i32, %arg1: memref<16x32xbf16, #tpu.memory_space<vmem>>, %arg2: memref<128x32xbf16, #tpu.memory_space<vmem>>, %arg3: memref<1x128xf32, #tpu.memory_space<vmem>>, %arg4: memref<16x128xf32, #tpu.memory_space<vmem>>) attributes {dimension_semantics = [#tpu.dimension_semantics<parallel>], iteration_bounds = array<i64: 1>, scalar_prefetch = 0 : i64, scratch_operands = 0 : i64, tpu.core_type = #tpu.core_type<tc>, window_params = [{transform_indices = @transform_0, window_bounds = array<i64: 16, 32>}, {pipeline_mode = #tpu.pipeline_mode<synchronous>, transform_indices = @transform_1, window_bounds = array<i64: 128, 32>}, {pipeline_mode = #tpu.pipeline_mode<synchronous>, transform_indices = @transform_2, window_bounds = array<i64: 1, 128>}, {transform_indices = @transform_3, window_bounds = array<i64: 16, 128>}]} {
    %c0 = arith.constant 0 : index
    %c0_0 = arith.constant 0 : index
    %0 = vector.load %arg1[%c0, %c0_0] : memref<16x32xbf16, #tpu.memory_space<vmem>>, vector<16x32xbf16>
    %c0_1 = arith.constant 0 : index
    %c0_2 = arith.constant 0 : index
    %1 = vector.load %arg2[%c0_1, %c0_2] : memref<128x32xbf16, #tpu.memory_space<vmem>>, vector<128x32xbf16>
    %cst = arith.constant dense<0.000000e+00> : vector<16x128xf32>
    %2 = tpu.matmul %0, %1, %cst {dimension_numbers = #tpu.dot_dimension_numbers<[1], [1], [0], [0], [0, 0, 1, 0], [], []>} : vector<16x32xbf16>, vector<128x32xbf16>, vector<16x128xf32> -> vector<16x128xf32>
    %c0_3 = arith.constant 0 : index
    %c0_4 = arith.constant 0 : index
    %3 = vector.load %arg3[%c0_3, %c0_4] : memref<1x128xf32, #tpu.memory_space<vmem>>, vector<1x128xf32>
    %4 = vector.broadcast %3 : vector<1x128xf32> to vector<16x128xf32>
    %5 = arith.addf %2, %4 : vector<16x128xf32>
    %c0_5 = arith.constant 0 : index
    %c0_6 = arith.constant 0 : index
    %6 = vector.load %arg4[%c0_5, %c0_6] : memref<16x128xf32, #tpu.memory_space<vmem>>, vector<16x128xf32>
    tpu.vector_store %arg4[%c0_5, %c0_6], %5 {strides = array<i32>} : memref<16x128xf32, #tpu.memory_space<vmem>>, vector<16x128xf32>,
    return
  }
  func.func @transform_0(%arg0: i32) -> (i32, i32) {
    %c0_i32 = arith.constant 0 : i32
    %c0_i32_0 = arith.constant 0 : i32
    return %arg0, %c0_i32 : i32, i32
  }
  func.func @transform_1(%arg0: i32) -> (i32, i32) {
    %c0_i32 = arith.constant 0 : i32
    %c0_i32_0 = arith.constant 0 : i32
    %c0_i32_1 = arith.constant 0 : i32
    return %c0_i32, %c0_i32_0 : i32, i32
  }
  func.func @transform_2(%arg0: i32) -> (i32, i32) {
    %c0_i32 = arith.constant 0 : i32
    %c0_i32_0 = arith.constant 0 : i32
    %c0_i32_1 = arith.constant 0 : i32
    return %c0_i32, %c0_i32_0 : i32, i32
  }
  func.func @transform_3(%arg0: i32) -> (i32, i32) {
    %c0_i32 = arith.constant 0 : i32
    %c0_i32_0 = arith.constant 0 : i32
    return %arg0, %c0_i32 : i32, i32
  }
}

</mosaic_0001>

<bundles_post_ra>
// kernel: tpu_custom_call.1
= control target key start
LH: loop header
LB: loop body
LE: loop exit
PB: predicated region body
PF: predicated region fallthrough
CT: control target
= control target key end

     0   :  { %vm82_vm0 = vcmask 261120   ;;  %s285_s0 = inlined_call_operand.vmem [shape: bf16[16,32], index: 0, kind: input, shape index: {}]   ;;  %s286_s1 = inlined_call_operand.vmem [shape: bf16[128,32], index: 1, kind: input, shape index: {}]   ;;  %s287_s2 = inlined_call_operand.vmem [shape: f32[1,128], index: 2, kind: input, shape index: {}]   ;;  %s288_s3 = inlined_call_operand.hbm [shape: f32[16,128], index: 3, kind: output, shape index: {}]  }
   0x1   :  { %v189_v0 = vld [vmem:[%s286_s1 + $0x38] sm:$0xff] }
   0x2   :  { %v108_v1 = vsel %vm82_vm0, %v189_v0, 0 }
   0x3   :  { %8 = vsyncpa [#allocation3], 0  ;;  %110 = vmatpush.bf16.xpose.msra.mxu0 %v108_v1  ;;  %v188_v2 = vld [vmem:[%s286_s1 + $0x30] sm:$0xff]  ;;  %v187_v4 = vld [vmem:[%s286_s1 + $0x28] sm:$0xff]  ;;  %s220_s5 = smov [#allocation2]   ;;  %s132_s8 = sshll.u32 %s288_s3, 4  ;;  %s133_s8 = int_to_ptr.hbm [resolvable:$true] %s132_s8 }
   0x4   :  { %v105_v3 = vsel %vm82_vm0, %v188_v2, 0  ;;  %v102_v5 = vsel %vm82_vm0, %v187_v4, 0  ;;  %v186_v6 = vld [vmem:[%s286_s1 + $0x20] sm:$0xff]  ;;  %v185_v8 = vld [vmem:[%s286_s1 + $0x18] sm:$0xff]  ;;  %v184_v10 = vld [vmem:[%s286_s1 + $0x10] sm:$0xff]  ;;  %s130_s6 = sshll.u32 %s220_s5, 4  ;;  %s131_s6 = int_to_ptr.vmem [resolvable:$true] %s130_s6 }
   0x5   :  { %v99_v7 = vsel %vm82_vm0, %v186_v6, 0  ;;  %v96_v9 = vsel %vm82_vm0, %v185_v8, 0  ;;  %v93_v11 = vsel %vm82_vm0, %v184_v10, 0  ;;  %v183_v12 = vld [vmem:[%s286_s1 + $0x8] sm:$0xff]  ;;  %v182_v14 = vld [vmem:[%s286_s1] sm:$0xff]  ;;  %s222_s9 = smov 8  }
   0x6   :  { %v90_v13 = vsel %vm82_vm0, %v183_v12, 0  ;;  %v87_v15 = vsel %vm82_vm0, %v182_v14, 0  ;;  %v181_v16 = vld [vmem:[%s285_s0] sm:$0xff]  ;;  %s221_s0 = smov 128  }
   0x7   :  { %v193_v17 = vld [vmem:[%s287_s2] ss:$0 sm:$0xff] }
   0xb   :  { %111 = vmatpush.bf16.xpose.msra.mxu0 %v105_v3 }
  0x13   :  { %112 = vmatpush.bf16.xpose.msra.mxu0 %v102_v5 }
  0x1b   :  { %113 = vmatpush.bf16.xpose.msra.mxu0 %v99_v7 }
  0x23   :  { %114 = vmatpush.bf16.xpose.msra.mxu0 %v96_v9 }
  0x2b   :  { %115 = vmatpush.bf16.xpose.msra.mxu0 %v93_v11 }
  0x33   :  { %116 = vmatpush.bf16.xpose.msra.mxu0 %v90_v13 }
  0x3b   :  { %117 = vmatpush.bf16.xpose.msra.mxu0 %v87_v15 }
  0x42   :  { %180 = vmatmul.msk.bf16.vlgmr.msra.gmra.mxu0 %vm82_vm0, %v181_v16 }
  0xbf   :  { %v119_v18 = vpop.f32.mrf.mxu0 }
  0xc0   :  { %v120_v19 = vadd.f32 %v193_v17, %v119_v18 }
  0xc2   :  { %124 = vst [vmem:[#allocation2] sm:$0xff] %v120_v19 }
  0xc7   :  { %v121_v20 = vpop.f32.mrf.mxu0 }
  0xc8   :  { %v122_v21 = vadd.f32 %v193_v17, %v121_v20 }
  0xca   :  { %125 = vst [vmem:[#allocation2 + $0x8] sm:$0xff] %v122_v21 }
  0xcb   :  { %138 = dma.vmem_to_hbm [thread:$0]  %s131_s6, 256, %s133_s8, [#allocation3], %s221_s0, %s221_s0, %s222_s9  }
  0xcc   :  { %218 = dma.done.wait [#allocation3], 256  }
  0xcd   :  { %219 = vsyncadd [#allocation3], 4294967040 }
  0xce   :  { %143 = vsyncpa [#allocation3], 1 }

</bundles_post_ra>
